<compile_context>
chip_gen: v6e
topology: v6e:2x2x1
jax: 0.10.0
libtpu: 0.0.40
codegen_flags: <defaults>
</compile_context>

<pallas_src>
import math

import jax
import jax.numpy as jnp
from jax.experimental import pallas as pl
from jax.experimental.pallas import tpu as pltpu


# ---------------------------------------------------------------------------
# pe table construction (the nn.Module constructor analog) -- built once,
# 2-D (max_len, d_model), in the compute dtype.
# ---------------------------------------------------------------------------
def make_pe_table(max_len: int, d_model: int, dtype=jnp.float32) -> jnp.ndarray:
    assert d_model % 2 == 0, "PositionalEncoding assumes even d_model"
    position = jnp.arange(max_len, dtype=jnp.float32)[:, None]                # (L, 1)
    div_term = jnp.exp(
        jnp.arange(0, d_model, 2, dtype=jnp.float32) * (-math.log(10000.0) / d_model)
    )                                                                         # (D/2,)
    angles = position * div_term                                              # (L, D/2)
    pe = jnp.zeros((max_len, d_model), dtype=jnp.float32)
    pe = pe.at[:, 0::2].set(jnp.sin(angles))
    pe = pe.at[:, 1::2].set(jnp.cos(angles))
    return pe.astype(dtype)                                                   # (L, D)


# ---------------------------------------------------------------------------
# Kernels
# ---------------------------------------------------------------------------
def _pe_add_kernel(x_ref, pe_ref, o_ref):
    # Main path: x/o and pe are all (ts, D) tiles -> plain elementwise add.
    o_ref[...] = x_ref[...] + pe_ref[...]
    # TODO(synk): training-mode dropout (p=0.1) is stochastic and cannot match
    # PyTorch's RNG stream; eval-mode dropout is the identity, implemented here.


def _pe_add_bcast_kernel(x_ref, pe_ref, o_ref):
    # Tiny-D fallback: x/o are (ts, B, D) contiguous tiles; pe is (ts, D) and is
    # broadcast along the batch (sublane) axis -- cheap, no lane relayout.
    pe = pe_ref[...]
    o_ref[...] = x_ref[...] + pe[:, None, :]


# ---------------------------------------------------------------------------
# Sizing helpers
# ---------------------------------------------------------------------------
def _vmem_capacity_bytes(default: int = 64 * 1024 * 1024) -> int:
    """Per-core VMEM capacity; conservative default if the query fails."""
    try:
        cap = getattr(pltpu.get_tpu_info(), "vmem_capacity_bytes", None)
        if cap:
            return int(cap)
    except Exception:
        pass
    return default


def _sublane_align(itemsize: int) -> int:
    # Sub-32-bit dtypes pack rows along sublanes in pairs/quads.
    return {4: 8, 2: 16, 1: 32}.get(itemsize, 8)


def _choose_seq_tile(S: int, per_row_bytes: int, budget_bytes: int,
                     align: int, min_tiles: int = 2) -> int:
    """Largest sequence-row tile whose working set fits the budget, clamped so
    the sequence axis has >= min_tiles blocks (v7x megacore) when possible."""
    ts = max(1, budget_bytes // max(per_row_bytes, 1))
    if min_tiles > 1:
        ts = min(ts, -(-S // min_tiles))   # cdiv(S, min_tiles)
    ts = min(ts, S)
    if ts < S:
        # Keep sublane-packing-aligned blocks when actually tiling.
        ts = max(align, (ts // align) * align)
        ts = min(ts, S)
    return int(ts)
    # TODO(synk): if B*D is so large that even an `align`-row block exceeds the
    # budget, the lane axis would also need to be split; not needed at the
    # shapes this module targets.


# ---------------------------------------------------------------------------
# Forward
# ---------------------------------------------------------------------------
def positional_encoding_forward(x: jnp.ndarray, pe_table: jnp.ndarray,
                                *, donate_x: bool = False) -> jnp.ndarray:
    """x: (S, B, D); pe_table: (max_len, D) pre-built in the compute dtype.

    Returns x + pe[:S] broadcast over batch (eval-mode dropout == identity).
    Set donate_x=True only if the caller donates x and never reads it again.
    """
    S, B, D = x.shape
    max_len, Dp = pe_table.shape
    assert Dp == D, "pe_table d_model mismatch"
    assert S <= max_len, "seq_len exceeds max_len"
    if pe_table.dtype != x.dtype:
        # Callers should cache the table in the compute dtype; this is a fallback.
        pe_table = pe_table.astype(x.dtype)

    itemsize = jnp.dtype(x.dtype).itemsize
    align = _sublane_align(itemsize)
    cap = _vmem_capacity_bytes()
    budget = cap // 3          # working-set budget used to size ts
    vmem_limit = cap // 2      # scoped VMEM limit handed to Mosaic

    io_aliases = {0: 0} if donate_x else {}

    if D * itemsize >= 512:
        # ---- main path: 2-D grid (seq_tiles, batch); pe resident across batch.
        # Per seq row: x tile + out tile + pe row (each D wide), double-buffered.
        per_row = 2 * (2 * D + D) * itemsize
        ts = _choose_seq_tile(S, per_row, budget, align)
        grid = (pl.cdiv(S, ts), B)
        out = pl.pallas_call(
            _pe_add_kernel,
            out_shape=jax.ShapeDtypeStruct((S, B, D), x.dtype),
            grid_spec=pl.GridSpec(
                grid=grid,
                in_specs=[
                    pl.BlockSpec((ts, None, D), lambda i, b: (i, b, 0)),  # x tile
                    pl.BlockSpec((ts, D), lambda i, b: (i, 0)),           # pe rows (batch-invariant)
                ],
                out_specs=pl.BlockSpec((ts, None, D), lambda i, b: (i, b, 0)),
            ),
            compiler_params=pltpu.CompilerParams(
                dimension_semantics=("parallel", "arbitrary"),
                vmem_limit_bytes=vmem_limit,
            ),
            input_output_aliases=io_aliases,
        )(x, pe_table)
    else:
        # ---- tiny-D fallback: contiguous (ts, B, D) blocks + sublane broadcast.
        # Per seq row: x + out (B*D wide, double-buffered) + pe row (double-
        # buffered) + one single-buffered broadcast temp.
        per_row = (2 * (2 * B * D + D) + B * D) * itemsize
        ts = _choose_seq_tile(S, per_row, budget, align)
        grid = (pl.cdiv(S, ts),)
        out = pl.pallas_call(
            _pe_add_bcast_kernel,
            out_shape=jax.ShapeDtypeStruct((S, B, D), x.dtype),
            grid_spec=pl.GridSpec(
                grid=grid,
                in_specs=[
                    pl.BlockSpec((ts, B, D), lambda i: (i, 0, 0)),  # x tile (dense DMA)
                    pl.BlockSpec((ts, D), lambda i: (i, 0)),        # narrow pe rows
                ],
                out_specs=pl.BlockSpec((ts, B, D), lambda i: (i, 0, 0)),
            ),
            compiler_params=pltpu.CompilerParams(
                dimension_semantics=("parallel",),
                vmem_limit_bytes=vmem_limit,
            ),
            input_output_aliases=io_aliases,
        )(x, pe_table)

    return out


# ---------------------------------------------------------------------------
# Self-test
# ---------------------------------------------------------------------------
if __name__ == "__main__":
    key = jax.random.PRNGKey(0)
    k1, k2 = jax.random.split(key)

    # Case 1: tiny d_model (exercises the contiguous-block sublane-broadcast path).
    S1, B1, D1, L1 = 8, 2, 32, 64
    x1 = jax.random.normal(k1, (S1, B1, D1), dtype=jnp.float32)
    pe1 = make_pe_table(L1, D1, dtype=x1.dtype)          # built once, compute dtype
    ref1 = x1 + pe1[:S1][:, None, :]
    out1 = jax.block_until_ready(positional_encoding_forward(x1, pe1))
    assert out1.shape == (S1, B1, D1)
    assert jnp.allclose(out1, ref1, atol=1e-6, rtol=1e-6)

    # Case 2: wider d_model (exercises the 2-D (seq, batch) grid path with real
    # sequence tiling and batch-resident pe blocks).
    S2, B2, D2, L2 = 24, 2, 256, 64
    x2 = jax.random.normal(k2, (S2, B2, D2), dtype=jnp.float32)
    pe2 = make_pe_table(L2, D2, dtype=x2.dtype)
    ref2 = x2 + pe2[:S2][:, None, :]
    out2 = jax.block_until_ready(positional_encoding_forward(x2, pe2))
    assert out2.shape == (S2, B2, D2)
    assert jnp.allclose(out2, ref2, atol=1e-6, rtol=1e-6)

    print("KERNEL_OK")
</pallas_src>

<mosaic_0001>
module attributes {stable_mosaic.version = 11 : i64} {
  func.func @_pe_add_bcast_kernel(%arg0: i32, %arg1: memref<8x2x32xf32, #tpu.memory_space<vmem>>, %arg2: memref<8x32xf32, #tpu.memory_space<vmem>>, %arg3: memref<8x2x32xf32, #tpu.memory_space<vmem>>) attributes {dimension_semantics = [#tpu.dimension_semantics<parallel>], iteration_bounds = array<i64: 1>, scalar_prefetch = 0 : i64, scratch_operands = 0 : i64, tpu.core_type = #tpu.core_type<tc>, window_params = [{transform_indices = @transform_0, window_bounds = array<i64: 8, 2, 32>}, {transform_indices = @transform_1, window_bounds = array<i64: 8, 32>}, {transform_indices = @transform_2, window_bounds = array<i64: 8, 2, 32>}]} {
    %c0 = arith.constant 0 : index
    %c0_0 = arith.constant 0 : index
    %0 = vector.load %arg2[%c0, %c0_0] : memref<8x32xf32, #tpu.memory_space<vmem>>, vector<8x32xf32>
    %c0_1 = arith.constant 0 : index
    %c0_2 = arith.constant 0 : index
    %c0_3 = arith.constant 0 : index
    %1 = vector.load %arg1[%c0_1, %c0_2, %c0_3] : memref<8x2x32xf32, #tpu.memory_space<vmem>>, vector<8x2x32xf32>
    %2 = vector.shape_cast %0 : vector<8x32xf32> to vector<8x1x32xf32>
    %3 = vector.broadcast %2 : vector<8x1x32xf32> to vector<8x2x32xf32>
    %4 = arith.addf %1, %3 : vector<8x2x32xf32>
    %c0_4 = arith.constant 0 : index
    %c0_5 = arith.constant 0 : index
    %c0_6 = arith.constant 0 : index
    %5 = vector.load %arg3[%c0_4, %c0_5, %c0_6] : memref<8x2x32xf32, #tpu.memory_space<vmem>>, vector<8x2x32xf32>
    tpu.vector_store %arg3[%c0_4, %c0_5, %c0_6], %4 {strides = array<i32>} : memref<8x2x32xf32, #tpu.memory_space<vmem>>, vector<8x2x32xf32>,
    return
  }
  func.func @transform_0(%arg0: i32) -> (i32, i32, i32) {
    %c0_i32 = arith.constant 0 : i32
    %c0_i32_0 = arith.constant 0 : i32
    %c0_i32_1 = arith.constant 0 : i32
    return %arg0, %c0_i32, %c0_i32_0 : i32, i32, i32
  }
  func.func @transform_1(%arg0: i32) -> (i32, i32) {
    %c0_i32 = arith.constant 0 : i32
    %c0_i32_0 = arith.constant 0 : i32
    return %arg0, %c0_i32 : i32, i32
  }
  func.func @transform_2(%arg0: i32) -> (i32, i32, i32) {
    %c0_i32 = arith.constant 0 : i32
    %c0_i32_0 = arith.constant 0 : i32
    %c0_i32_1 = arith.constant 0 : i32
    return %arg0, %c0_i32, %c0_i32_0 : i32, i32, i32
  }
}

</mosaic_0001>

<bundles_post_ra>
// kernel: tpu_custom_call.1
= control target key start
LH: loop header
LB: loop body
LE: loop exit
PB: predicated region body
PF: predicated region fallthrough
CT: control target
= control target key end

     0   :  { %v26_v1 = vlaneseq  ;;  %v170_v2 = vmov 1966171168   ;;  %s227_s0 = inlined_call_operand.vmem [shape: f32[8,2,32], index: 0, kind: input, shape index: {}]   ;;  %s228_s1 = inlined_call_operand.vmem [shape: f32[64,32], index: 1, kind: input, shape index: {}]   ;;  %s229_s2 = inlined_call_operand.hbm [shape: f32[8,2,32], index: 2, kind: output, shape index: {}]  }
   0x1   :  { %v12_v0 = vld [vmem:[%s228_s1] sm:$0xff]  ;;  %v24_v3 = vunpack.c.l.s4 %v170_v2 }
   0x2   :  { %v27_v4 = vshrl.u32 %v26_v1, 7  ;;  %v22_v6 = vcombine.high %v12_v0, %v12_v0 }
   0x3   :  { %v25_v5 = vunpack.c.0.s8 %v24_v3 }
   0x4   :  { %7 = vsyncpa [#allocation3], 0  ;;  %v73_v9 = vsub.s32 0, %v27_v4  ;;  %v13_v15 = vld [vmem:[%s227_s0] sm:$0x3]  ;;  %vm119_vm0 = vcmask 254976  }
   0x5   :  { %v28_v7 = vsub.s32 %v25_v5, %v27_v4  ;;  %v17_v19 = vld [vmem:[%s227_s0 + $0x8] sm:$0x3]  ;;  %v14_v21 = vld [vmem:[%s227_s0 + $0x2] sm:$0x3]  ;;  %v15_v22 = vld [vmem:[%s227_s0 + $0x4] sm:$0x3] }
   0x6   :  { %v18_v29 = vld [vmem:[%s227_s0 + $0xa] sm:$0x3]  ;;  %v19_v30 = vld [vmem:[%s227_s0 + $0xc] sm:$0x3]  ;;  %v16_v31 = vld [vmem:[%s227_s0 + $0x6] sm:$0x3] }
   0x7   :  { %v29_v8 = vrot.slane %v12_v0, %v28_v7  ;;  %v36_v10 = vrot.slane %v22_v6, %v28_v7  ;;  %v20_v39 = vld [vmem:[%s227_s0 + $0xe] sm:$0x3]  ;;  %s171_s26 = smov [#allocation2]  }
   0x8   :  { %s133_s27 = sshll.u32 %s171_s26, 4  ;;  %s134_s27 = int_to_ptr.vmem [resolvable:$true] %s133_s27 }
   0x9   :  { %v45_v11 = vrot.slane %v29_v8, %v28_v7  ;;  %v37_v12 = vcombine.high %v29_v8, %v29_v8  ;;  %v52_v13 = vrot.slane %v36_v10, %v28_v7  ;;  %v38_v14 = vcombine.high %v36_v10, %v36_v10  ;;  %s148_s0 = scalar_lea.vmem %s134_s27, 256  ;;  %p153_p1 = scmp.lt.s32.totalorder %s134_s27, %s134_s27 }
   0xa   :  { %p149_p0 = scmp.ne.s32.totalorder %s134_s27, %s148_s0  ;;  %p154_p2 = scmp.lt.s32.totalorder %s148_s0, %s148_s0 }
   0xb   :  { %v74_v16 = vrot.slane %v45_v11, %v73_v9  ;;  %v59_v17 = vrot.slane %v37_v12, %v28_v7  ;;  %v67_v18 = vcombine.high %v45_v11, %v45_v11  ;;  %v90_v20 = vrot.slane %v52_v13, %v73_v9 }
   0xc   :  { %v66_v23 = vrot.slane %v38_v14, %v28_v7  ;;  %v68_v24 = vcombine.high %v52_v13, %v52_v13  ;;  %p155_p3 = por %p154_p2, %p153_p1 }
   0xd   :  { %v111_v25 = vadd.f32 %v74_v16, %v13_v15  ;;  %v78_v26 = vrot.slane %v59_v17, %v73_v9  ;;  %v82_v27 = vrot.slane %v67_v18, %v73_v9  ;;  %v69_v28 = vcombine.high %v59_v17, %v59_v17 }
   0xe   :  { %v115_v32 = vadd.f32 %v90_v20, %v17_v19  ;;  %v94_v33 = vrot.slane %v66_v23, %v73_v9  ;;  %v98_v34 = vrot.slane %v68_v24, %v73_v9  ;;  %v70_v35 = vcombine.high %v66_v23, %v66_v23  ;;  %p156_p4 = pnand %p155_p3, %p149_p0 }
   0xf   :  { %120 = vst.msk [vmem:[#allocation2] sm:$0x3] %vm119_vm0, %v111_v25  ;;  %v112_v36 = vadd.f32 %v78_v26, %v14_v21  ;;  %v113_v37 = vadd.f32 %v82_v27, %v15_v22  ;;  %v86_v38 = vrot.slane %v69_v28, %v73_v9 }
  0x10   :  { %124 = vst.msk [vmem:[#allocation2 + $0x8] sm:$0x3] %vm119_vm0, %v115_v32  ;;  %v116_v40 = vadd.f32 %v94_v33, %v18_v29  ;;  %v117_v41 = vadd.f32 %v98_v34, %v19_v30  ;;  %v102_v42 = vrot.slane %v70_v35, %v73_v9 }
  0x11   :  { %121 = vst.msk [vmem:[#allocation2 + $0x2] sm:$0x3] %vm119_vm0, %v112_v36  ;;  %122 = vst.msk [vmem:[#allocation2 + $0x4] sm:$0x3] %vm119_vm0, %v113_v37  ;;  %v114_v43 = vadd.f32 %v86_v38, %v16_v31 }
  0x12   :  { %125 = vst.msk [vmem:[#allocation2 + $0xa] sm:$0x3] %vm119_vm0, %v116_v40  ;;  %126 = vst.msk [vmem:[#allocation2 + $0xc] sm:$0x3] %vm119_vm0, %v117_v41  ;;  %v118_v44 = vadd.f32 %v102_v42, %v20_v39 }
  0x13   :  { %123 = vst.msk [vmem:[#allocation2 + $0x6] sm:$0x3] %vm119_vm0, %v114_v43 }
  0x14   :  { %127 = vst.msk [vmem:[#allocation2 + $0xe] sm:$0x3] %vm119_vm0, %v118_v44 }
  0x15   :  { %159 = shalt.err (!%p156_p4)
}
  0x16   :  { %s172_s28 = smov 32   ;;  %s173_s29 = smov 2  }
  0x17   :  { %139 = dma.vmem_to_hbm [thread:$0]  %s134_s27, 256, %s229_s2, [#allocation3], %s172_s28, %s172_s28, %s173_s29  }
  0x18   :  { %168 = dma.done.wait [#allocation3], 256  }
  0x19   :  { %169 = vsyncadd [#allocation3], 4294967040 }
  0x1a   :  { %143 = vsyncpa [#allocation3], 1 }

</bundles_post_ra>
